<compile_context>
chip_gen: v7x
topology: tpu7x:2x2x1
jax: 0.10.0
libtpu: 0.0.40
codegen_flags: <defaults>
</compile_context>

<pallas_src>
import functools

import jax
import jax.numpy as jnp
from jax import lax
from jax.experimental import pallas as pl
from jax.experimental.pallas import tpu as pltpu


def _vicreg_tile_kernel(za_i_ref, zb_i_ref, za_j_ref, zb_j_ref, out_ref,
                        acc_ref, *, N, D, lambda_, mu, nu, epsilon):
    i = pl.program_id(0)
    j = pl.program_id(1)

    inv_n = 1.0 / N
    inv_nm1 = 1.0 / (N - 1)
    cov_scale = nu / (float(N - 1) ** 2 * D)   # nu * sum(cov^2) / D, folded

    @pl.when(j == 0)
    def _init():
        acc_ref[...] = jnp.zeros_like(acc_ref)

    # ---- load + center both feature tiles (elementwise math in f32) ----
    # TODO(synk): for bf16 projector outputs, feed bf16 operands straight to
    # the MXU (preferred_element_type=f32) to halve HBM->VMEM bytes.
    za_j = za_j_ref[...].astype(jnp.float32)            # (N, tD)
    zb_j = zb_j_ref[...].astype(jnp.float32)
    za_jc = za_j - jnp.sum(za_j, axis=0, keepdims=True) * inv_n
    zb_jc = zb_j - jnp.sum(zb_j, axis=0, keepdims=True) * inv_n

    za_ic = za_i_ref[...].astype(jnp.float32)
    zb_ic = zb_i_ref[...].astype(jnp.float32)
    za_ic = za_ic - jnp.sum(za_ic, axis=0, keepdims=True) * inv_n
    zb_ic = zb_ic - jnp.sum(zb_ic, axis=0, keepdims=True) * inv_n

    # ---- covariance block: contract over the batch axis on the MXU ----
    dn = (((0,), (0,)), ((), ()))                        # lhs^T @ rhs, no .T
    g_a = lax.dot_general(za_ic, za_jc, dimension_numbers=dn,
                          preferred_element_type=jnp.float32)
    g_b = lax.dot_general(zb_ic, zb_jc, dimension_numbers=dn,
                          preferred_element_type=jnp.float32)
    acc_ref[...] += cov_scale * (jnp.sum(g_a * g_a) + jnp.sum(g_b * g_b))

    # ---- per-feature-tile (j) terms, counted exactly once (i == 0 row) ----
    @pl.when(i == 0)
    def _per_feature():
        diff = za_j - zb_j
        sim = (lambda_ / (N * D)) * jnp.sum(diff * diff)

        s_a = jnp.sum(za_jc * za_jc, axis=0, keepdims=True)   # (1, tD)
        s_b = jnp.sum(zb_jc * zb_jc, axis=0, keepdims=True)
        std_a = jnp.sqrt(s_a * inv_nm1 + epsilon)
        std_b = jnp.sqrt(s_b * inv_nm1 + epsilon)
        hinge = (mu / D) * (jnp.sum(jnp.maximum(1.0 - std_a, 0.0))
                            + jnp.sum(jnp.maximum(1.0 - std_b, 0.0)))
        # diag(cov) == per-feature variance; remove it from sum(cov^2).
        diag_corr = cov_scale * (jnp.sum(s_a * s_a) + jnp.sum(s_b * s_b))
        acc_ref[...] += sim + hinge - diag_corr

    @pl.when(j == pl.num_programs(1) - 1)
    def _finalize():
        out_ref[...] = acc_ref[...]


def _pick_feature_tile(N, D, itemsize=4, budget_bytes=24 * 1024 * 1024):
    """Largest MXU-friendly (multiple-of-256/128) feature tile whose pipeline
    buffers (4 inputs x 2 buffers) fit a VMEM budget safe on v7x (64 MiB)."""
    if D <= 512:
        return D
    candidates = [t for t in (512, 256, 128) if D % t == 0]
    for t in candidates:
        if 8 * N * t * itemsize <= budget_bytes:
            return t
    if candidates:
        return candidates[-1]
    # TODO(synk): masked ragged-edge handling for D not a multiple of 128;
    # fall back to a single feature tile (also no batch tiling for huge N).
    return D


def vicreg_loss(z_a, z_b, *, lambda_=25.0, mu=25.0, nu=1.0, epsilon=1e-4):
    if z_a.shape != z_b.shape or z_a.ndim != 2:
        raise ValueError("z_a and z_b must be 2-D with identical shapes.")
    N, D = z_a.shape
    if N < 2:
        raise ValueError("VICReg needs batch size N >= 2 (unbiased variance).")

    tD = _pick_feature_tile(N, D)
    nD = D // tD

    kernel = functools.partial(
        _vicreg_tile_kernel, N=N, D=D, lambda_=float(lambda_),
        mu=float(mu), nu=float(nu), epsilon=float(epsilon))

    lhs_spec = pl.BlockSpec((N, tD), lambda i, j: (0, i))   # Di tile
    rhs_spec = pl.BlockSpec((N, tD), lambda i, j: (0, j))   # Dj tile
    out_spec = pl.BlockSpec((1, 8, 128), lambda i, j: (i, 0, 0))

    itemsize = 4
    tile_bytes = N * tD * itemsize
    # 4 input tiles x 2 pipeline buffers + 4 centered temporaries
    # + 2 (tD, tD) matmul results + output/scratch rows, with 25% headroom.
    vmem_need = 8 * tile_bytes + 4 * tile_bytes + 2 * tD * tD * 4 + 4 * 8 * 128 * 4
    vmem_limit = int(min(max(vmem_need * 5 // 4, 8 * 1024 * 1024),
                         56 * 1024 * 1024))

    cost = pl.CostEstimate(
        flops=4 * N * D * D + 16 * N * D,
        transcendentals=2 * D,
        bytes_accessed=4 * nD * nD * tile_bytes + nD * 8 * 128 * 4,
    )

    partials = pl.pallas_call(
        kernel,
        out_shape=jax.ShapeDtypeStruct((nD, 8, 128), jnp.float32),
        grid_spec=pltpu.PrefetchScalarGridSpec(
            num_scalar_prefetch=0,
            grid=(nD, nD),
            in_specs=[lhs_spec, lhs_spec, rhs_spec, rhs_spec],
            out_specs=out_spec,
            scratch_shapes=[pltpu.VMEM((1, 8, 128), jnp.float32)],
        ),
        compiler_params=pltpu.CompilerParams(
            dimension_semantics=("parallel", "arbitrary"),
            vmem_limit_bytes=vmem_limit,
        ),
        cost_estimate=cost,
    )(z_a, z_b, z_a, z_b)

    # Each (8,128) row holds one broadcast partial sum; combine per-Di rows.
    return jnp.sum(partials[:, 0, 0])


def _vicreg_ref(z_a, z_b, lambda_=25.0, mu=25.0, nu=1.0, epsilon=1e-4):
    """Pure-JAX reference mirroring the PyTorch forward exactly."""
    N, D = z_a.shape
    sim_loss = jnp.mean((z_a - z_b) ** 2)
    std_a = jnp.sqrt(jnp.var(z_a, axis=0, ddof=1) + epsilon)
    std_b = jnp.sqrt(jnp.var(z_b, axis=0, ddof=1) + epsilon)
    std_loss = jnp.mean(jnp.maximum(1 - std_a, 0)) + jnp.mean(jnp.maximum(1 - std_b, 0))
    za_c = z_a - z_a.mean(axis=0)
    zb_c = z_b - z_b.mean(axis=0)
    cov_a = za_c.T @ za_c / (N - 1)
    cov_b = zb_c.T @ zb_c / (N - 1)
    mask = ~jnp.eye(D, dtype=bool)
    cov_loss = jnp.sum(jnp.where(mask, cov_a, 0.0) ** 2) / D \
             + jnp.sum(jnp.where(mask, cov_b, 0.0) ** 2) / D
    return lambda_ * sim_loss + mu * std_loss + nu * cov_loss


if __name__ == "__main__":
    key = jax.random.PRNGKey(0)
    k1, k2, k3, k4 = jax.random.split(key, 4)

    # Small shapes consistent with the module: batch=8, projector dim=32.
    N, D = 8, 32
    z_a = jax.random.normal(k1, (N, D), dtype=jnp.float32)
    z_b = z_a + 0.1 * jax.random.normal(k2, (N, D), dtype=jnp.float32)
    loss = jax.block_until_ready(vicreg_loss(z_a, z_b))
    ref = jax.block_until_ready(_vicreg_ref(z_a, z_b))
    assert jnp.allclose(loss, ref, rtol=1e-4, atol=1e-4), (loss, ref)

    # Second check exercising the multi-tile (Di, Dj) grid path.
    N2, D2 = 16, 1024
    w_a = jax.random.normal(k3, (N2, D2), dtype=jnp.float32)
    w_b = w_a + 0.1 * jax.random.normal(k4, (N2, D2), dtype=jnp.float32)
    loss2 = jax.block_until_ready(vicreg_loss(w_a, w_b))
    ref2 = jax.block_until_ready(_vicreg_ref(w_a, w_b))
    assert jnp.allclose(loss2, ref2, rtol=5e-3, atol=5e-3), (loss2, ref2)

    print("KERNEL_OK")
</pallas_src>

<mosaic_0001>
module attributes {stable_mosaic.version = 11 : i64} {
  func.func @_vicreg_tile_kernel(%arg0: i32, %arg1: i32, %arg2: memref<8x32xf32, #tpu.memory_space<vmem>>, %arg3: memref<8x32xf32, #tpu.memory_space<vmem>>, %arg4: memref<8x32xf32, #tpu.memory_space<vmem>>, %arg5: memref<8x32xf32, #tpu.memory_space<vmem>>, %arg6: memref<1x8x128xf32, #tpu.memory_space<vmem>>, %arg7: memref<1x8x128xf32, #tpu.memory_space<vmem>>) attributes {dimension_semantics = [#tpu.dimension_semantics<parallel>, #tpu.dimension_semantics<arbitrary>], iteration_bounds = array<i64: 1, 1>, scalar_prefetch = 0 : i64, scratch_operands = 1 : i64, tpu.core_type = #tpu.core_type<tc>, window_params = [{transform_indices = @transform_0, window_bounds = array<i64: 8, 32>}, {transform_indices = @transform_1, window_bounds = array<i64: 8, 32>}, {transform_indices = @transform_2, window_bounds = array<i64: 8, 32>}, {transform_indices = @transform_3, window_bounds = array<i64: 8, 32>}, {transform_indices = @transform_4, window_bounds = array<i64: 1, 8, 128>}]} {
    %c0_i32 = arith.constant 0 : i32
    %0 = arith.cmpi eq, %arg1, %c0_i32 : i32
    %1 = arith.extui %0 : i1 to i32
    %c0_i32_0 = arith.constant 0 : i32
    %2 = arith.cmpi ne, %1, %c0_i32_0 : i32
    scf.if %2 {
      %cst_30 = arith.constant 0.000000e+00 : f32
      %55 = vector.broadcast %cst_30 : f32 to vector<1x8x128xf32>
      %c0_31 = arith.constant 0 : index
      %c0_32 = arith.constant 0 : index
      %c0_33 = arith.constant 0 : index
      %56 = vector.load %arg7[%c0_31, %c0_32, %c0_33] : memref<1x8x128xf32, #tpu.memory_space<vmem>>, vector<1x8x128xf32>
      tpu.vector_store %arg7[%c0_31, %c0_32, %c0_33], %55 {strides = array<i32>} : memref<1x8x128xf32, #tpu.memory_space<vmem>>, vector<1x8x128xf32>,
    } else {
    }
    %c0 = arith.constant 0 : index
    %c0_1 = arith.constant 0 : index
    %3 = vector.load %arg4[%c0, %c0_1] : memref<8x32xf32, #tpu.memory_space<vmem>>, vector<8x32xf32>
    %c0_2 = arith.constant 0 : index
    %c0_3 = arith.constant 0 : index
    %4 = vector.load %arg5[%c0_2, %c0_3] : memref<8x32xf32, #tpu.memory_space<vmem>>, vector<8x32xf32>
    %cst = arith.constant dense<0.000000e+00> : vector<32xf32>
    %5 = vector.multi_reduction <add>, %3, %cst [0] : vector<8x32xf32> to vector<32xf32>
    %6 = vector.shape_cast %5 : vector<32xf32> to vector<1x32xf32>
    %cst_4 = arith.constant 1.250000e-01 : f32
    %7 = vector.broadcast %cst_4 : f32 to vector<1x32xf32>
    %8 = arith.mulf %6, %7 : vector<1x32xf32>
    %9 = vector.broadcast %8 : vector<1x32xf32> to vector<8x32xf32>
    %10 = arith.subf %3, %9 : vector<8x32xf32>
    %cst_5 = arith.constant dense<0.000000e+00> : vector<32xf32>
    %11 = vector.multi_reduction <add>, %4, %cst_5 [0] : vector<8x32xf32> to vector<32xf32>
    %12 = vector.shape_cast %11 : vector<32xf32> to vector<1x32xf32>
    %cst_6 = arith.constant 1.250000e-01 : f32
    %13 = vector.broadcast %cst_6 : f32 to vector<1x32xf32>
    %14 = arith.mulf %12, %13 : vector<1x32xf32>
    %15 = vector.broadcast %14 : vector<1x32xf32> to vector<8x32xf32>
    %16 = arith.subf %4, %15 : vector<8x32xf32>
    %c0_7 = arith.constant 0 : index
    %c0_8 = arith.constant 0 : index
    %17 = vector.load %arg2[%c0_7, %c0_8] : memref<8x32xf32, #tpu.memory_space<vmem>>, vector<8x32xf32>
    %c0_9 = arith.constant 0 : index
    %c0_10 = arith.constant 0 : index
    %18 = vector.load %arg3[%c0_9, %c0_10] : memref<8x32xf32, #tpu.memory_space<vmem>>, vector<8x32xf32>
    %cst_11 = arith.constant dense<0.000000e+00> : vector<32xf32>
    %19 = vector.multi_reduction <add>, %17, %cst_11 [0] : vector<8x32xf32> to vector<32xf32>
    %20 = vector.shape_cast %19 : vector<32xf32> to vector<1x32xf32>
    %cst_12 = arith.constant 1.250000e-01 : f32
    %21 = vector.broadcast %cst_12 : f32 to vector<1x32xf32>
    %22 = arith.mulf %20, %21 : vector<1x32xf32>
    %23 = vector.broadcast %22 : vector<1x32xf32> to vector<8x32xf32>
    %24 = arith.subf %17, %23 : vector<8x32xf32>
    %cst_13 = arith.constant dense<0.000000e+00> : vector<32xf32>
    %25 = vector.multi_reduction <add>, %18, %cst_13 [0] : vector<8x32xf32> to vector<32xf32>
    %26 = vector.shape_cast %25 : vector<32xf32> to vector<1x32xf32>
    %cst_14 = arith.constant 1.250000e-01 : f32
    %27 = vector.broadcast %cst_14 : f32 to vector<1x32xf32>
    %28 = arith.mulf %26, %27 : vector<1x32xf32>
    %29 = vector.broadcast %28 : vector<1x32xf32> to vector<8x32xf32>
    %30 = arith.subf %18, %29 : vector<8x32xf32>
    %cst_15 = arith.constant dense<0.000000e+00> : vector<32x32xf32>
    %31 = tpu.matmul %24, %10, %cst_15 {dimension_numbers = #tpu.dot_dimension_numbers<[0], [0], [1], [1], [0, 1, 1, 1], [], []>} : vector<8x32xf32>, vector<8x32xf32>, vector<32x32xf32> -> vector<32x32xf32>
    %cst_16 = arith.constant dense<0.000000e+00> : vector<32x32xf32>
    %32 = tpu.matmul %30, %16, %cst_16 {dimension_numbers = #tpu.dot_dimension_numbers<[0], [0], [1], [1], [0, 1, 1, 1], [], []>} : vector<8x32xf32>, vector<8x32xf32>, vector<32x32xf32> -> vector<32x32xf32>
    %c0_17 = arith.constant 0 : index
    %c0_18 = arith.constant 0 : index
    %c0_19 = arith.constant 0 : index
    %33 = vector.load %arg7[%c0_17, %c0_18, %c0_19] : memref<1x8x128xf32, #tpu.memory_space<vmem>>, vector<1x8x128xf32>
    %34 = arith.mulf %31, %31 : vector<32x32xf32>
    %35 = vector.shape_cast %34 : vector<32x32xf32> to vector<1x32x32xf32>
    %cst_20 = arith.constant dense<0.000000e+00> : vector<1xf32>
    %36 = vector.multi_reduction <add>, %35, %cst_20 [1, 2] : vector<1x32x32xf32> to vector<1xf32>
    %37 = vector.shape_cast %36 : vector<1xf32> to vector<1x1x1xf32>
    %38 = vector.extract %37[0, 0, 0] : f32 from vector<1x1x1xf32>
    %39 = arith.mulf %32, %32 : vector<32x32xf32>
    %40 = vector.shape_cast %39 : vector<32x32xf32> to vector<1x32x32xf32>
    %cst_21 = arith.constant dense<0.000000e+00> : vector<1xf32>
    %41 = vector.multi_reduction <add>, %40, %cst_21 [1, 2] : vector<1x32x32xf32> to vector<1xf32>
    %42 = vector.shape_cast %41 : vector<1xf32> to vector<1x1x1xf32>
    %43 = vector.extract %42[0, 0, 0] : f32 from vector<1x1x1xf32>
    %44 = arith.addf %38, %43 : f32
    %cst_22 = arith.constant 6.37755089E-4 : f32
    %45 = arith.mulf %cst_22, %44 : f32
    %46 = vector.broadcast %45 : f32 to vector<1x8x128xf32>
    %47 = arith.addf %33, %46 : vector<1x8x128xf32>
    %c0_23 = arith.constant 0 : index
    %c0_24 = arith.constant 0 : index
    %c0_25 = arith.constant 0 : index
    %48 = vector.load %arg7[%c0_23, %c0_24, %c0_25] : memref<1x8x128xf32, #tpu.memory_space<vmem>>, vector<1x8x128xf32>
    tpu.vector_store %arg7[%c0_23, %c0_24, %c0_25], %47 {strides = array<i32>} : memref<1x8x128xf32, #tpu.memory_space<vmem>>, vector<1x8x128xf32>,
    %c0_i32_26 = arith.constant 0 : i32
    %49 = arith.cmpi eq, %arg0, %c0_i32_26 : i32
    %50 = arith.extui %49 : i1 to i32
    %c0_i32_27 = arith.constant 0 : i32
    %51 = arith.cmpi ne, %50, %c0_i32_27 : i32
    scf.if %51 {
      %55 = arith.subf %3, %4 : vector<8x32xf32>
      %56 = arith.mulf %55, %55 : vector<8x32xf32>
      %57 = vector.shape_cast %56 : vector<8x32xf32> to vector<1x8x32xf32>
      %cst_30 = arith.constant dense<0.000000e+00> : vector<1xf32>
      %58 = vector.multi_reduction <add>, %57, %cst_30 [1, 2] : vector<1x8x32xf32> to vector<1xf32>
      %59 = vector.shape_cast %58 : vector<1xf32> to vector<1x1x1xf32>
      %60 = vector.extract %59[0, 0, 0] : f32 from vector<1x1x1xf32>
      %cst_31 = arith.constant 0.09765625 : f32
      %61 = arith.mulf %cst_31, %60 : f32
      %62 = arith.mulf %10, %10 : vector<8x32xf32>
      %cst_32 = arith.constant dense<0.000000e+00> : vector<32xf32>
      %63 = vector.multi_reduction <add>, %62, %cst_32 [0] : vector<8x32xf32> to vector<32xf32>
      %64 = vector.shape_cast %63 : vector<32xf32> to vector<1x32xf32>
      %65 = arith.mulf %16, %16 : vector<8x32xf32>
      %cst_33 = arith.constant dense<0.000000e+00> : vector<32xf32>
      %66 = vector.multi_reduction <add>, %65, %cst_33 [0] : vector<8x32xf32> to vector<32xf32>
      %67 = vector.shape_cast %66 : vector<32xf32> to vector<1x32xf32>
      %cst_34 = arith.constant 0.142857149 : f32
      %68 = vector.broadcast %cst_34 : f32 to vector<1x32xf32>
      %69 = arith.mulf %64, %68 : vector<1x32xf32>
      %cst_35 = arith.constant 9.99999974E-5 : f32
      %70 = vector.broadcast %cst_35 : f32 to vector<1x32xf32>
      %71 = arith.addf %69, %70 : vector<1x32xf32>
      %72 = math.sqrt %71 : vector<1x32xf32>
      %cst_36 = arith.constant 0.142857149 : f32
      %73 = vector.broadcast %cst_36 : f32 to vector<1x32xf32>
      %74 = arith.mulf %67, %73 : vector<1x32xf32>
      %cst_37 = arith.constant 9.99999974E-5 : f32
      %75 = vector.broadcast %cst_37 : f32 to vector<1x32xf32>
      %76 = arith.addf %74, %75 : vector<1x32xf32>
      %77 = math.sqrt %76 : vector<1x32xf32>
      %cst_38 = arith.constant 1.000000e+00 : f32
      %78 = vector.broadcast %cst_38 : f32 to vector<1x32xf32>
      %79 = arith.subf %78, %72 : vector<1x32xf32>
      %cst_39 = arith.constant 0.000000e+00 : f32
      %80 = vector.broadcast %cst_39 : f32 to vector<1x32xf32>
      %81 = arith.maximumf %79, %80 : vector<1x32xf32>
      %82 = vector.shape_cast %81 : vector<1x32xf32> to vector<1x1x32xf32>
      %cst_40 = arith.constant dense<0.000000e+00> : vector<1xf32>
      %83 = vector.multi_reduction <add>, %82, %cst_40 [1, 2] : vector<1x1x32xf32> to vector<1xf32>
      %84 = vector.shape_cast %83 : vector<1xf32> to vector<1x1x1xf32>
      %85 = vector.extract %84[0, 0, 0] : f32 from vector<1x1x1xf32>
      %cst_41 = arith.constant 1.000000e+00 : f32
      %86 = vector.broadcast %cst_41 : f32 to vector<1x32xf32>
      %87 = arith.subf %86, %77 : vector<1x32xf32>
      %cst_42 = arith.constant 0.000000e+00 : f32
      %88 = vector.broadcast %cst_42 : f32 to vector<1x32xf32>
      %89 = arith.maximumf %87, %88 : vector<1x32xf32>
      %90 = vector.shape_cast %89 : vector<1x32xf32> to vector<1x1x32xf32>
      %cst_43 = arith.constant dense<0.000000e+00> : vector<1xf32>
      %91 = vector.multi_reduction <add>, %90, %cst_43 [1, 2] : vector<1x1x32xf32> to vector<1xf32>
      %92 = vector.shape_cast %91 : vector<1xf32> to vector<1x1x1xf32>
      %93 = vector.extract %92[0, 0, 0] : f32 from vector<1x1x1xf32>
      %94 = arith.addf %85, %93 : f32
      %cst_44 = arith.constant 7.812500e-01 : f32
      %95 = arith.mulf %cst_44, %94 : f32
      %96 = arith.mulf %64, %64 : vector<1x32xf32>
      %97 = vector.shape_cast %96 : vector<1x32xf32> to vector<1x1x32xf32>
      %cst_45 = arith.constant dense<0.000000e+00> : vector<1xf32>
      %98 = vector.multi_reduction <add>, %97, %cst_45 [1, 2] : vector<1x1x32xf32> to vector<1xf32>
      %99 = vector.shape_cast %98 : vector<1xf32> to vector<1x1x1xf32>
      %100 = vector.extract %99[0, 0, 0] : f32 from vector<1x1x1xf32>
      %101 = arith.mulf %67, %67 : vector<1x32xf32>
      %102 = vector.shape_cast %101 : vector<1x32xf32> to vector<1x1x32xf32>
      %cst_46 = arith.constant dense<0.000000e+00> : vector<1xf32>
      %103 = vector.multi_reduction <add>, %102, %cst_46 [1, 2] : vector<1x1x32xf32> to vector<1xf32>
      %104 = vector.shape_cast %103 : vector<1xf32> to vector<1x1x1xf32>
      %105 = vector.extract %104[0, 0, 0] : f32 from vector<1x1x1xf32>
      %106 = arith.addf %100, %105 : f32
      %cst_47 = arith.constant 6.37755089E-4 : f32
      %107 = arith.mulf %cst_47, %106 : f32
      %c0_48 = arith.constant 0 : index
      %c0_49 = arith.constant 0 : index
      %c0_50 = arith.constant 0 : index
      %108 = vector.load %arg7[%c0_48, %c0_49, %c0_50] : memref<1x8x128xf32, #tpu.memory_space<vmem>>, vector<1x8x128xf32>
      %109 = arith.addf %61, %95 : f32
      %110 = arith.subf %109, %107 : f32
      %111 = vector.broadcast %110 : f32 to vector<1x8x128xf32>
      %112 = arith.addf %108, %111 : vector<1x8x128xf32>
      %c0_51 = arith.constant 0 : index
      %c0_52 = arith.constant 0 : index
      %c0_53 = arith.constant 0 : index
      %113 = vector.load %arg7[%c0_51, %c0_52, %c0_53] : memref<1x8x128xf32, #tpu.memory_space<vmem>>, vector<1x8x128xf32>
      tpu.vector_store %arg7[%c0_51, %c0_52, %c0_53], %112 {strides = array<i32>} : memref<1x8x128xf32, #tpu.memory_space<vmem>>, vector<1x8x128xf32>,
    } else {
    }
    %c0_i32_28 = arith.constant 0 : i32
    %52 = arith.cmpi eq, %arg1, %c0_i32_28 : i32
    %53 = arith.extui %52 : i1 to i32
    %c0_i32_29 = arith.constant 0 : i32
    %54 = arith.cmpi ne, %53, %c0_i32_29 : i32
    scf.if %54 {
      %c0_30 = arith.constant 0 : index
      %c0_31 = arith.constant 0 : index
      %c0_32 = arith.constant 0 : index
      %55 = vector.load %arg7[%c0_30, %c0_31, %c0_32] : memref<1x8x128xf32, #tpu.memory_space<vmem>>, vector<1x8x128xf32>
      %c0_33 = arith.constant 0 : index
      %c0_34 = arith.constant 0 : index
      %c0_35 = arith.constant 0 : index
      %56 = vector.load %arg6[%c0_33, %c0_34, %c0_35] : memref<1x8x128xf32, #tpu.memory_space<vmem>>, vector<1x8x128xf32>
      tpu.vector_store %arg6[%c0_33, %c0_34, %c0_35], %55 {strides = array<i32>} : memref<1x8x128xf32, #tpu.memory_space<vmem>>, vector<1x8x128xf32>,
    } else {
    }
    return
  }
  func.func @transform_0(%arg0: i32, %arg1: i32) -> (i32, i32) {
    %c0_i32 = arith.constant 0 : i32
    %c0_i32_0 = arith.constant 0 : i32
    return %c0_i32, %arg0 : i32, i32
  }
  func.func @transform_1(%arg0: i32, %arg1: i32) -> (i32, i32) {
    %c0_i32 = arith.constant 0 : i32
    %c0_i32_0 = arith.constant 0 : i32
    return %c0_i32, %arg0 : i32, i32
  }
  func.func @transform_2(%arg0: i32, %arg1: i32) -> (i32, i32) {
    %c0_i32 = arith.constant 0 : i32
    %c0_i32_0 = arith.constant 0 : i32
    return %c0_i32, %arg1 : i32, i32
  }
  func.func @transform_3(%arg0: i32, %arg1: i32) -> (i32, i32) {
    %c0_i32 = arith.constant 0 : i32
    %c0_i32_0 = arith.constant 0 : i32
    return %c0_i32, %arg1 : i32, i32
  }
  func.func @transform_4(%arg0: i32, %arg1: i32) -> (i32, i32, i32) {
    %c0_i32 = arith.constant 0 : i32
    %c0_i32_0 = arith.constant 0 : i32
    %c0_i32_1 = arith.constant 0 : i32
    return %arg0, %c0_i32, %c0_i32_0 : i32, i32, i32
  }
}

</mosaic_0001>

<bundles_post_ra>
// kernel: tpu_custom_call.1
= control target key start
LH: loop header
LB: loop body
LE: loop exit
PB: predicated region body
PF: predicated region fallthrough
CT: control target
= control target key end

     0   :  { %9 = vsyncpa [#allocation4], 0  ;;  %s801_s0 = inlined_call_operand.hbm [shape: f32[8,32], index: 0, kind: input, shape index: {}]   ;;  %s802_s1 = inlined_call_operand.hbm [shape: f32[8,32], index: 1, kind: input, shape index: {}]   ;;  %s803_s2 = inlined_call_operand.hbm [shape: f32[8,32], index: 2, kind: input, shape index: {}]   ;;  %s804_s3 = inlined_call_operand.vmem [shape: f32[8,32], index: 3, kind: input, shape index: {}]   ;;  %s805_s4 = inlined_call_operand.hbm [shape: f32[1,8,128], index: 4, kind: output, shape index: {}]  }
   0x1   :  { %10 = vsyncpa [#allocation7], 0 }
   0x2   :  { %11 = vsyncpa [#allocation5], 0  ;;  %s684_s15 = smov [#allocation6]   ;;  %s685_s17 = smov [#allocation3]  }
   0x3   :  { %s28_s16 = sshll.u32 %s684_s15, 4  ;;  %s18_s18 = sshll.u32 %s685_s17, 4  ;;  %s29_s16 = int_to_ptr.vmem [resolvable:$true] %s28_s16  ;;  %s19_s18 = int_to_ptr.vmem [resolvable:$true] %s18_s18 }
   0x4   :  { %s590_s21 = scalar_lea.hbm %s802_s1, 128 }
   0x5   :  { %p591_p0 = scmp.ne.s32.totalorder %s802_s1, %s590_s21  ;;  %p594_p1 = scmp.lt.u32.totalorder %s590_s21, %s802_s1 }
   0x7   :  { %p596_p2 = pnand %p594_p1, %p591_p0 }
   0x9   :  { %599 = shalt.err (!%p596_p2)
}
   0xa   :  { %s600_s26 = scalar_lea.vmem %s29_s16, 128  ;;  %p605_p4 = scmp.lt.s32.totalorder %s29_s16, %s29_s16 }
   0xb   :  { %p601_p3 = scmp.ne.s32.totalorder %s29_s16, %s600_s26  ;;  %p606_p5 = scmp.lt.s32.totalorder %s600_s26, %s600_s26 }
   0xd   :  { %p607_p6 = por %p606_p5, %p605_p4 }
   0xf   :  { %p608_p7 = pnand %p607_p6, %p601_p3 }
  0x11   :  { %611 = shalt.err (!%p608_p7)
}
  0x12   :  { %31 = dma.hbm_to_vmem [thread:$0]  %s802_s1, 128, %s29_s16, [#allocation7]  }
  0x13   :  { %s612_s5 = scalar_lea.hbm %s801_s0, 128 }
  0x14   :  { %p613_p8 = scmp.ne.s32.totalorder %s801_s0, %s612_s5  ;;  %p616_p9 = scmp.lt.u32.totalorder %s612_s5, %s801_s0 }
  0x16   :  { %p618_p10 = pnand %p616_p9, %p613_p8 }
  0x18   :  { %621 = shalt.err (!%p618_p10)
}
  0x19   :  { %s622_s10 = scalar_lea.vmem %s19_s18, 128  ;;  %p627_p12 = scmp.lt.s32.totalorder %s19_s18, %s19_s18 }
  0x1a   :  { %p623_p11 = scmp.ne.s32.totalorder %s19_s18, %s622_s10  ;;  %p628_p13 = scmp.lt.s32.totalorder %s622_s10, %s622_s10 }
  0x1c   :  { %p629_p0 = por %p628_p13, %p627_p12 }
  0x1e   :  { %p630_p1 = pnand %p629_p0, %p623_p11 }
  0x20   :  { %633 = shalt.err (!%p630_p1)
}
  0x21   :  { %21 = dma.hbm_to_vmem [thread:$0]  %s801_s0, 128, %s19_s18, [#allocation4]  }
  0x22   :  { %s686_s12 = smov [#allocation8]   ;;  %s634_s16 = scalar_lea.hbm %s803_s2, 128 }
  0x23   :  { %s38_s13 = sshll.u32 %s686_s12, 4  ;;  %p635_p2 = scmp.ne.s32.totalorder %s803_s2, %s634_s16  ;;  %s39_s13 = int_to_ptr.vmem [resolvable:$true] %s38_s13 }
  0x24   :  { %p638_p3 = scmp.lt.u32.totalorder %s634_s16, %s803_s2 }
  0x26   :  { %p640_p4 = pnand %p638_p3, %p635_p2 }
  0x28   :  { %643 = shalt.err (!%p640_p4)
}
  0x29   :  { %s644_s22 = scalar_lea.vmem %s39_s13, 128  ;;  %p649_p6 = scmp.lt.s32.totalorder %s39_s13, %s39_s13 }
  0x2a   :  { %p645_p5 = scmp.ne.s32.totalorder %s39_s13, %s644_s22  ;;  %p650_p7 = scmp.lt.s32.totalorder %s644_s22, %s644_s22 }
  0x2c   :  { %p651_p8 = por %p650_p7, %p649_p6 }
  0x2e   :  { %p652_p9 = pnand %p651_p8, %p645_p5 }
  0x30   :  { %655 = shalt.err (!%p652_p9)
}
  0x31   :  { %41 = dma.hbm_to_vmem [thread:$0]  %s803_s2, 128, %s39_s13, [#allocation7]  }
  0x32   :  { %678 = dma.done.wait [#allocation4], 128  }
  0x33   :  { %679 = vsyncadd [#allocation4], 4294967168 }
  0x34   :  { %680 = dma.done.wait [#allocation7], 256  }
  0x35   :  { %681 = vsyncadd [#allocation7], 4294967040  ;;  %vm60_vm0 = vcmask 261120   ;;  %v79_v0 = vld [vmem:[#allocation3] sm:$0xff]  ;;  %v80_v1 = vld [vmem:[#allocation6] sm:$0xff]  ;;  %vm131_vm1 = vcmask 64512  }
  0x36   :  { %v81_v2 = vsel %vm60_vm0, %v79_v0, 0.0  ;;  %v90_v3 = vsel %vm60_vm0, %v80_v1, 0.0  ;;  %v751_v6 = vld [vmem:[#allocation8] sm:$0xff]  ;;  %v59_v28 = vld [vmem:[%s804_s3] sm:$0xff]  ;;  %vm457_vm6 = vcmask 253952   ;;  %s687_s12 = smov [#allocation9]  }
  0x37   :  { %v82_v4 = vrot.slane %v81_v2, 4  ;;  %v91_v5 = vrot.slane %v90_v3, 4  ;;  %v61_v9 = vsel %vm60_vm0, %v751_v6, 0.0  ;;  %v70_v29 = vsel %vm60_vm0, %v59_v28, 0.0  ;;  %s523_s13 = sshll.u32 %s687_s12, 4  ;;  %s524_s13 = int_to_ptr.vmem [resolvable:$true] %s523_s13 }
  0x38   :  { %v62_v10 = vrot.slane %v61_v9, 4  ;;  %v71_v30 = vrot.slane %v70_v29, 4  ;;  %s656_s14 = scalar_lea.vmem %s524_s13, 128  ;;  %p661_p11 = scmp.lt.s32.totalorder %s524_s13, %s524_s13 }
  0x39   :  { %v83_v7 = vadd.f32 %v82_v4, %v81_v2  ;;  %v92_v8 = vadd.f32 %v91_v5, %v90_v3  ;;  %v408_v5 = vsub.f32 %v751_v6, %v59_v28  ;;  %p657_p10 = scmp.ne.s32.totalorder %s524_s13, %s656_s14  ;;  %p662_p12 = scmp.lt.s32.totalorder %s656_s14, %s656_s14 }
  0x3a   :  { %v63_v13 = vadd.f32 %v62_v10, %v61_v9  ;;  %v72_v32 = vadd.f32 %v71_v30, %v70_v29 }
  0x3b   :  { %v84_v11 = vrot.slane %v83_v7, 2  ;;  %v93_v12 = vrot.slane %v92_v8, 2  ;;  %v409_v9 = vmul.f32 %v408_v5, %v408_v5  ;;  %p663_p13 = por %p662_p12, %p661_p11 }
  0x3c   :  { %v64_v15 = vrot.slane %v63_v13, 2  ;;  %v73_v33 = vrot.slane %v72_v32, 2 }
  0x3d   :  { %v85_v14 = vadd.f32 %v84_v11, %v83_v7  ;;  %v94_v17 = vadd.f32 %v93_v12, %v92_v8  ;;  %p664_p0 = pnand %p663_p13, %p657_p10 }
  0x3e   :  { %v65_v18 = vadd.f32 %v64_v15, %v63_v13  ;;  %v74_v35 = vadd.f32 %v73_v33, %v72_v32  ;;  %v410_v13 = vsel %vm60_vm0, %v409_v9, 0.0 }
  0x3f   :  { %v86_v16 = vrot.slane %v85_v14, 1  ;;  %v95_v22 = vrot.slane %v94_v17, 1  ;;  %411 = vadd.xlane.f32.xlu1 %v410_v13 }
  0x40   :  { %v66_v20 = vrot.slane %v65_v18, 1  ;;  %v75_v36 = vrot.slane %v74_v35, 1 }
  0x41   :  { %v87_v19 = vadd.f32 %v86_v16, %v85_v14  ;;  %v96_v26 = vadd.f32 %v95_v22, %v94_v17 }
  0x42   :  { %v67_v23 = vadd.f32 %v66_v20, %v65_v18  ;;  %v76_v37 = vadd.f32 %v75_v36, %v74_v35 }
  0x43   :  { %v88_v21 = vmul.f32 0.125, %v87_v19  ;;  %v97_v31 = vmul.f32 0.125, %v96_v26 }
  0x44   :  { %v68_v25 = vmul.f32 0.125, %v67_v23  ;;  %v77_v38 = vmul.f32 0.125, %v76_v37 }
  0x45   :  { %v89_v24 = vsub.f32 %v79_v0, %v88_v21  ;;  %v98_v34 = vsub.f32 %v80_v1, %v97_v31 }
  0x46   :  { %v69_v27 = vsub.f32 %v751_v6, %v68_v25  ;;  %v78_v39 = vsub.f32 %v59_v28, %v77_v38 }
  0x47   :  { %99 = vxpose.xlu0.b32.start.end [1/1] (short) (narrow) %v89_v24, 32 }
  0x48   :  { %551 = vmatprep.subr.mxu0 %v69_v27  ;;  %559 = vmatprep.subr.mxu1 %v78_v39  ;;  %v421_v48 = vmul.f32 %v69_v27, %v69_v27  ;;  %v429_v50 = vmul.f32 %v78_v39, %v78_v39 }
  0x49   :  { %552 = vmatpush3.msra.mxu0 %v69_v27  ;;  %560 = vmatpush3.msra.mxu1 %v78_v39 }
  0x4a   :  { %v422_v49 = vsel %vm60_vm0, %v421_v48, 0.0  ;;  %v430_v52 = vsel %vm60_vm0, %v429_v50, 0.0 }
  0x4b   :  { %v423_v51 = vrot.slane %v422_v49, 4  ;;  %v431_v54 = vrot.slane %v430_v52, 4 }
  0x4d   :  { %v424_v53 = vadd.f32 %v423_v51, %v422_v49  ;;  %v432_v56 = vadd.f32 %v431_v54, %v430_v52 }
  0x4f   :  { %v425_v55 = vrot.slane %v424_v53, 2  ;;  %v433_v58 = vrot.slane %v432_v56, 2 }
  0x51   :  { %v426_v57 = vadd.f32 %v425_v55, %v424_v53  ;;  %v434_v60 = vadd.f32 %v433_v58, %v432_v56 }
  0x53   :  { %v427_v59 = vrot.slane %v426_v57, 1  ;;  %v435_v62 = vrot.slane %v434_v60, 1 }
  0x54   :  { %229 = vxpose.xlu0.b32.start.end [1/1] (short) (narrow) %v98_v34, 32 }
  0x55   :  { %v428_v61 = vadd.f32 %v427_v59, %v426_v57  ;;  %v770_v0 = vadd.f32 %v435_v62, %v434_v60 }
  0x57   :  { %v437_v63 = vmul.f32 0.14285715, %v428_v61  ;;  %v446_v2 = vmul.f32 0.14285715, %v770_v0  ;;  %v482_v23 = vmul.f32 %v428_v61, %v428_v61  ;;  %v493_v54 = vmul.f32 %v770_v0, %v770_v0 }
  0x59   :  { %v438_v1 = vadd.f32 0.0001, %v437_v63  ;;  %v447_v3 = vadd.f32 0.0001, %v446_v2  ;;  %v483_v24 = vsel %vm457_vm6, %v482_v23, 0.0  ;;  %v494_v56 = vsel %vm457_vm6, %v493_v54, 0.0 }
  0x5b   :  { %586 = vrsqrt.f32 %v438_v1  ;;  %vm441_vm2 = vcmp.eq.f32.partialorder %v438_v1, inf  ;;  %v444_v8 = vand.u32 2147483648, %v438_v1  ;;  %vm443_vm3 = vcmp.eq.f32.partialorder %v438_v1, 0.0 }
  0x5c   :  { %588 = vrsqrt.f32 %v447_v3  ;;  %vm450_vm4 = vcmp.eq.f32.partialorder %v447_v3, inf  ;;  %v453_v16 = vand.u32 2147483648, %v447_v3  ;;  %vm452_vm5 = vcmp.eq.f32.partialorder %v447_v3, 0.0 }
  0x65   :  { %v587_v4 = vpop.eup %586 }
  0x66   :  { %v440_v7 = vmul.f32 %v587_v4, %v438_v1  ;;  %v589_v11 = vpop.eup %588 }
  0x67   :  { %v449_v15 = vmul.f32 %v589_v11, %v447_v3 }
  0x68   :  { %v442_v10 = vsel %vm441_vm2, %v438_v1, %v440_v7 }
  0x69   :  { %v445_v12 = vsel %vm443_vm3, %v444_v8, %v442_v10  ;;  %v451_v18 = vsel %vm450_vm4, %v447_v3, %v449_v15 }
  0x6a   :  { %v455_v14 = vsub.f32 1.0, %v445_v12  ;;  %v454_v6 = vsel %vm452_vm5, %v453_v16, %v451_v18 }
  0x6b   :  { %v468_v20 = vsub.f32 1.0, %v454_v6 }
  0x6c   :  { %v456_v17 = vmax.f32 %v455_v14, 0.0 }
  0x6d   :  { %v469_v21 = vmax.f32 %v468_v20, 0.0 }
  0x6e   :  { %v458_v19 = vsel %vm457_vm6, %v456_v17, 0.0 }
  0x6f   :  { %459 = vadd.xlane.f32.xlu1 %v458_v19  ;;  %v470_v22 = vsel %vm457_vm6, %v469_v21, 0.0 }
  0x73   :  { %471 = vadd.xlane.f32.xlu1 %v470_v22 }
  0x8d   :  { %484 = vadd.xlane.f32.xlu0 %v483_v24 }
  0xc7   :  { %v115_v40 = vpop.trf.xlu0 }
  0xc8   :  { %553 = vmatprep.mubr.msk.f32.mxu0 %vm131_vm1, %v115_v40 }
  0xcb   :  { %v116_v41 = vpop.trf.xlu0 }
  0xcc   :  { %554 = vmatmul.mubr.msk.f32.vlgmr.msra.gmra.mrb[0].mxu0 %vm131_vm1, %v116_v41  ;;  %v412_v57 = vpop.xlane.xlu1 %411 }
  0xcd   :  { %v413_v2 = vrot.slane %v412_v57, 4 }
  0xcf   :  { %v117_v42 = vpop.trf.xlu0  ;;  %v414_v9 = vadd.f32 %v413_v2, %v412_v57 }
  0xd0   :  { %556 = vmatprep.mubr.msk.f32.mxu0 %vm131_vm1, %v117_v42 }
  0xd1   :  { %v415_v13 = vrot.slane %v414_v9, 2 }
  0xd3   :  { %v118_v43 = vpop.trf.xlu0  ;;  %v416_v20 = vadd.f32 %v415_v13, %v414_v9 }
  0xd4   :  { %557 = vmatmul.mubr.msk.f32.gmra.mrb[2].mxu0 %vm131_vm1, %v118_v43 }
  0xd7   :  { %v245_v44 = vpop.trf.xlu0 }
  0xd8   :  { %561 = vmatprep.mubr.msk.f32.mxu1 %vm131_vm1, %v245_v44 }
  0xdb   :  { %v246_v45 = vpop.trf.xlu0 }
  0xdc   :  { %562 = vmatmul.mubr.msk.f32.vlgmr.msra.gmra.mrb[0].mxu1 %vm131_vm1, %v246_v45 }
  0xdf   :  { %v247_v46 = vpop.trf.xlu0 }
  0xe0   :  { %564 = vmatprep.mubr.msk.f32.mxu1 %vm131_vm1, %v247_v46 }
  0xe3   :  { %v248_v47 = vpop.trf.xlu0 }
  0xe4   :  { %565 = vmatmul.mubr.msk.f32.gmra.mrb[2].mxu1 %vm131_vm1, %v248_v47 }
  0xfc   :  { %v460_v58 = vpop.xlane.xlu1 %459 }
  0xfd   :  { %v461_v4 = vrot.slane %v460_v58, 4 }
  0xff   :  { %v462_v10 = vadd.f32 %v461_v4, %v460_v58 }
 0x100   :  { %v472_v59 = vpop.xlane.xlu1 %471 }
 0x101   :  { %v473_v7 = vrot.slane %v472_v59, 4  ;;  %v463_v15 = vrot.slane %v462_v10, 2 }
 0x103   :  { %v474_v11 = vadd.f32 %v473_v7, %v472_v59  ;;  %v464_v23 = vadd.f32 %v463_v15, %v462_v10 }
 0x105   :  { %v475_v17 = vrot.slane %v474_v11, 2 }
 0x107   :  { %v476_v24 = vadd.f32 %v475_v17, %v474_v11 }
 0x11a   :  { %v485_v3 = vpop.xlane.xlu0 %484 }
 0x11b   :  { %v486_v0 = vrot.slane %v485_v3, 4 }
 0x11d   :  { %v487_v12 = vadd.f32 %v486_v0, %v485_v3 }
 0x11f   :  { %v488_v18 = vrot.slane %v487_v12, 2 }
 0x19f   :  { %v555_v25 = vpop.f32.mrb[0].mxu0 }
 0x1a0   :  { %v360_v26 = vmul.f32 %v555_v25, %v555_v25  ;;  %v210_v27 = vpop.f32.mrb[1].mxu0  ;;  %v489_v25 = vadd.f32 %v488_v18, %v487_v12 }
 0x1a1   :  { %v359_v28 = vmul.f32 %v210_v27, %v210_v27 }
 0x1a2   :  { %v364_v29 = vsel %vm60_vm0, %v360_v26, 0.0 }
 0x1a3   :  { %v363_v30 = vsel %vm60_vm0, %v359_v28, 0.0  ;;  %v417_v28 = vrot.slane %v416_v20, 1 }
 0x1a4   :  { %v365_v31 = vadd.f32 %v364_v29, %v363_v30 }
 0x1a7   :  { %v558_v32 = vpop.f32.mrb[2].mxu0 }
 0x1a8   :  { %v220_v33 = vpop.f32.mrb[3].mxu0  ;;  %v362_v34 = vmul.f32 %v558_v32, %v558_v32  ;;  %v477_v32 = vrot.slane %v476_v24, 1 }
 0x1a9   :  { %v361_v35 = vmul.f32 %v220_v33, %v220_v33 }
 0x1aa   :  { %v368_v38 = vsel %vm60_vm0, %v362_v34, 0.0 }
 0x1ab   :  { %v366_v36 = vsel %vm60_vm0, %v361_v35, 0.0  ;;  %v490_v35 = vrot.slane %v489_v25, 1 }
 0x1ac   :  { %v367_v37 = vadd.f32 %v366_v36, %v365_v31  ;;  %v465_v31 = vrot.slane %v464_v23, 1  ;;  %v418_v36 = vadd.f32 %v417_v28, %v416_v20 }
 0x1ae   :  { %v369_v39 = vadd.f32 %v368_v38, %v367_v37  ;;  %v466_v37 = vadd.f32 %v465_v31, %v464_v23 }
 0x1af   :  { %v563_v40 = vpop.f32.mrb[0].mxu1 }
 0x1b0   :  { %v380_v41 = vmul.f32 %v563_v40, %v563_v40  ;;  %v339_v42 = vpop.f32.mrb[1].mxu1  ;;  %370 = vadd.xlane.f32.xlu1 %v369_v39  ;;  %v478_v39 = vadd.f32 %v477_v32, %v476_v24  ;;  %v491_v40 = vadd.f32 %v490_v35, %v489_v25 }
 0x1b1   :  { %v379_v43 = vmul.f32 %v339_v42, %v339_v42 }
 0x1b2   :  { %v384_v44 = vsel %vm60_vm0, %v380_v41, 0.0 }
 0x1b3   :  { %v383_v45 = vsel %vm60_vm0, %v379_v43, 0.0 }
 0x1b4   :  { %v385_v46 = vadd.f32 %v384_v44, %v383_v45 }
 0x1b7   :  { %v566_v47 = vpop.f32.mrb[2].mxu1 }
 0x1b8   :  { %v349_v48 = vpop.f32.mrb[3].mxu1  ;;  %v382_v49 = vmul.f32 %v566_v47, %v566_v47 }
 0x1b9   :  { %v381_v50 = vmul.f32 %v349_v48, %v349_v48 }
 0x1ba   :  { %v388_v53 = vsel %vm60_vm0, %v382_v49, 0.0 }
 0x1bb   :  { %v386_v51 = vsel %vm60_vm0, %v381_v50, 0.0 }
 0x1bc   :  { %v387_v52 = vadd.f32 %v386_v51, %v385_v46 }
 0x1be   :  { %v389_v55 = vadd.f32 %v388_v53, %v387_v52 }
 0x1c0   :  { %390 = vadd.xlane.f32.xlu1 %v389_v55 }
 0x1c4   :  { %495 = vadd.xlane.f32.xlu1 %v494_v56 }
 0x23d   :  { %v371_v60 = vpop.xlane.xlu1 %370 }
 0x23e   :  { %v372_v61 = vrot.slane %v371_v60, 4 }
 0x240   :  { %v373_v62 = vadd.f32 %v372_v61, %v371_v60 }
 0x242   :  { %v374_v63 = vrot.slane %v373_v62, 2 }
 0x244   :  { %v375_v1 = vadd.f32 %v374_v63, %v373_v62 }
 0x246   :  { %v376_v5 = vrot.slane %v375_v1, 1 }
 0x248   :  { %v377_v8 = vadd.f32 %v376_v5, %v375_v1 }
 0x24a   :  { %567 = vpush %v377_v8 }
 0x24d   :  { %v391_v14 = vpop.xlane.xlu1 %390 }
 0x24e   :  { %v392_v16 = vrot.slane %v391_v14, 4 }
 0x250   :  { %v393_v6 = vadd.f32 %v392_v16, %v391_v14 }
 0x251   :  { %v496_v19 = vpop.xlane.xlu1 %495 }
 0x252   :  { %v394_v21 = vrot.slane %v393_v6, 2  ;;  %v497_v22 = vrot.slane %v496_v19, 4 }
 0x254   :  { %v498_v26 = vadd.f32 %v497_v22, %v496_v19  ;;  %v395_v27 = vadd.f32 %v394_v21, %v393_v6 }
 0x256   :  { %v499_v29 = vrot.slane %v498_v26, 2  ;;  %v396_v30 = vrot.slane %v395_v27, 1 }
 0x258   :  { %v500_v33 = vadd.f32 %v499_v29, %v498_v26  ;;  %v397_v34 = vadd.f32 %v396_v30, %v395_v27 }
 0x25a   :  { %569 = vpush %v397_v34  ;;  %v501_v38 = vrot.slane %v500_v33, 1 }
 0x25b   :  { %571 = vpush %v418_v36 }
 0x25c   :  { %573 = vpush %v466_v37  ;;  %v502_v41 = vadd.f32 %v501_v38, %v500_v33 }
 0x25d   :  { %575 = vpush %v478_v39 }
 0x25e   :  { %577 = vpush %v491_v40 }
 0x25f   :  { %579 = vpush %v502_v41 }
 0x27b   :  { %s568_s3 = spop %567 }
 0x28b   :  { %s570_s24 = spop %569 }
 0x28c   :  { %s572_s25 = spop %571  ;;  %s399_s27 = sadd.f32 %s570_s24, %s568_s3 }
 0x28d   :  { %s574_s26 = spop %573  ;;  %s420_s5 = smul.f32 0.09765625, %s572_s25 }
 0x28e   :  { %s576_s28 = spop %575  ;;  %s400_s9 = smul.f32 0.0006377551, %s399_s27 }
 0x28f   :  { %s480_s29 = sadd.f32 %s576_s28, %s574_s26  ;;  %s578_s30 = spop %577 }
 0x290   :  { %s580_s6 = spop %579  ;;  %v401_v42 = vstv %s400_s9 }
 0x291   :  { %s481_s7 = smul.f32 0.78125, %s480_s29  ;;  %s504_s8 = sadd.f32 %s580_s6, %s578_s30 }
 0x293   :  { %s507_s10 = sadd.f32 %s481_s7, %s420_s5  ;;  %s505_s1 = smul.f32 0.0006377551, %s504_s8 }
 0x295   :  { %s508_s11 = ssub.f32 %s507_s10, %s505_s1 }
 0x297   :  { %v509_v43 = vstv %s508_s11 }
 0x298   :  { %v510_v44 = vadd.f32 %v509_v43, %v401_v42 }
 0x29a   :  { %516 = vst [vmem:[#allocation9] sm:$0xff] %v510_v44 }
 0x29b   :  { %667 = shalt.err (!%p664_p0)
}
 0x29c   :  { %s668_s17 = scalar_lea.hbm %s805_s4, 128 }
 0x29d   :  { %p669_p1 = scmp.ne.s32.totalorder %s805_s4, %s668_s17  ;;  %p672_p2 = scmp.lt.u32.totalorder %s668_s17, %s805_s4 }
 0x29f   :  { %p674_p3 = pnand %p672_p2, %p669_p1 }
 0x2a1   :  { %677 = shalt.err (!%p674_p3)
}
 0x2a2   :  { %526 = dma.vmem_to_hbm [thread:$0]  %s524_s13, 128, %s805_s4, [#allocation5]  }
 0x2a3   :  { %682 = dma.done.wait [#allocation5], 128  }
 0x2a4   :  { %683 = vsyncadd [#allocation5], 4294967168 }
 0x2a5   :  { %530 = vsyncpa [#allocation4], 1 }
 0x2a6   :  { %531 = vsyncpa [#allocation7], 1 }
 0x2a7   :  { %532 = vsyncpa [#allocation5], 1 }

</bundles_post_ra>
